<compile_context>
chip_gen: v7x
topology: tpu7x:2x2x1
jax: 0.10.0
libtpu: 0.0.40
codegen_flags: <defaults>
</compile_context>

<pallas_src>
import jax
import jax.numpy as jnp
from jax.experimental import pallas as pl
from jax.experimental.pallas import tpu as pltpu


# -----------------------------------------------------------------------------
# small helpers
# -----------------------------------------------------------------------------
def _round_up(x, m):
    return (x + m - 1) // m * m


def _sublane_align(dtype):
    # packed-sublane alignment: f32 -> 8, bf16 -> 16, int8/fp8 -> 32
    return {4: 8, 2: 16, 1: 32}.get(jnp.dtype(dtype).itemsize, 8)


def _pad_batch(batch, dtype, pref=256):
    """Pad batch to one full tile (<= pref) or a multiple of pref; tile divides pad."""
    align = _sublane_align(dtype)
    if batch <= pref:
        tb = _round_up(batch, align)
        return tb, tb
    return _round_up(batch, pref), pref


def _pad_dim(dim, pref=512):
    """Pad a lane dim UP to the preferred tile instead of shrinking the tile."""
    if dim <= pref:
        p = _round_up(dim, 128)
        return p, p
    p = _round_up(dim, pref)
    return p, pref


def _pad_to(a, shape):
    pads = [(0, t - s) for s, t in zip(a.shape, shape)]
    if all(p == (0, 0) for p in pads):
        return a
    return jnp.pad(a, pads)


def _vmem_limit():
    # Budget against the actual generation's VMEM (v7x has 64 MiB/TC, not 128).
    try:
        cap = int(pltpu.get_tpu_info().vmem_capacity_bytes)
    except Exception:
        cap = 64 * 1024 * 1024
    return cap * 3 // 4


def _emb_row_tiling(num_x, e_pad, itemsize):
    """(nx_pad, row_tile): table resident in VMEM if it fits, else streamed tiles."""
    budget = _vmem_limit() // 3
    nx128 = _round_up(num_x, 128)
    if nx128 * e_pad * itemsize <= budget:
        return nx128, nx128                       # fully resident, one row tile
    tr = 2048
    while tr > 128 and 2 * tr * e_pad * itemsize > budget:   # double-buffered tile
        tr //= 2
    return _round_up(num_x, tr), tr


def _fused_softmax_fits(v_pad, e_pad, nx128, compute_dtype, tb=256):
    """Rough per-call VMEM estimate for the fully fused softmax path."""
    isz = jnp.dtype(compute_dtype).itemsize
    tk = min(v_pad, 512)
    need = (2 * tb * tk * isz              # x tile (double-buffered)
            + 2 * tk * e_pad * isz         # w1 tile (double-buffered)
            + 8 * e_pad * 4                # b1 (Buffered(1), sublane-padded)
            + e_pad * nx128 * isz          # w2 (Buffered(1))
            + 8 * nx128 * 4                # b2 (Buffered(1))
            + 2 * tb * nx128 * isz         # output tile (double-buffered)
            + tb * e_pad * 4)              # hidden f32 scratch
    return need <= _vmem_limit()


# -----------------------------------------------------------------------------
# Kernel 1: tiled Linear + ReLU  (shared by both branches)
# -----------------------------------------------------------------------------
def _linear_relu_kernel(x_ref, w_ref, b_ref, o_ref, acc_ref):
    k = pl.program_id(2)

    @pl.when(k == 0)
    def _():
        acc_ref[...] = jnp.zeros_like(acc_ref)

    acc_ref[...] += jnp.dot(x_ref[...], w_ref[...],
                            preferred_element_type=jnp.float32)

    @pl.when(k == pl.num_programs(2) - 1)
    def _():
        o_ref[...] = jnp.maximum(acc_ref[...] + b_ref[...], 0.0).astype(o_ref.dtype)


def linear_relu_padded(x, w1, b1, out_dtype):
    """relu(x @ w1 + b1) -> padded [b_pad, e_pad] in out_dtype (caller slices)."""
    batch, _ = x.shape
    v_pad, e_pad = w1.shape
    b_pad, tb = _pad_batch(batch, w1.dtype)
    tk = min(v_pad, 512)
    te = min(e_pad, 512)
    x_p = _pad_to(x.astype(w1.dtype), (b_pad, v_pad))
    grid = (b_pad // tb, e_pad // te, v_pad // tk)            # reduction axis last
    return pl.pallas_call(
        _linear_relu_kernel,
        out_shape=jax.ShapeDtypeStruct((b_pad, e_pad), out_dtype),
        grid_spec=pltpu.PrefetchScalarGridSpec(
            num_scalar_prefetch=0,
            grid=grid,
            in_specs=[
                pl.BlockSpec((tb, tk), lambda i, j, k: (i, k)),
                pl.BlockSpec((tk, te), lambda i, j, k: (k, j)),
                pl.BlockSpec((1, te), lambda i, j, k: (0, j)),
            ],
            out_specs=pl.BlockSpec((tb, te), lambda i, j, k: (i, j)),
            scratch_shapes=[pltpu.VMEM((tb, te), jnp.float32)],
        ),
        compiler_params=pltpu.CompilerParams(
            dimension_semantics=("parallel", "parallel", "arbitrary"),
            vmem_limit_bytes=_vmem_limit(),
        ),
    )(x_p, w1, b1)


# -----------------------------------------------------------------------------
# Kernel 2: fused Linear + ReLU + Linear + Softmax (small/medium num_x)
# -----------------------------------------------------------------------------
def _fused_softmax_kernel(x_ref, w1_ref, b1_ref, w2_ref, b2_ref, o_ref, h_ref):
    k = pl.program_id(1)

    @pl.when(k == 0)
    def _():
        h_ref[...] = jnp.zeros_like(h_ref)

    h_ref[...] += jnp.dot(x_ref[...], w1_ref[...],
                          preferred_element_type=jnp.float32)

    @pl.when(k == pl.num_programs(1) - 1)
    def _():
        h = jnp.maximum(h_ref[...] + b1_ref[...], 0.0)
        logits = jnp.dot(h.astype(w2_ref.dtype), w2_ref[...],
                         preferred_element_type=jnp.float32) + b2_ref[...]
        m = jnp.max(logits, axis=-1, keepdims=True)
        e = jnp.exp(logits - m)
        inv = 1.0 / jnp.sum(e, axis=-1, keepdims=True)   # exact normalization
        o_ref[...] = (e * inv).astype(o_ref.dtype)


def fused_linear_relu_linear_softmax(x, w1, b1, w2, b2, out_dim, out_dtype):
    batch, _ = x.shape
    v_pad, e_pad = w1.shape
    _, nx_pad = w2.shape
    b_pad, tb = _pad_batch(batch, w1.dtype)
    tk = min(v_pad, 512)
    x_p = _pad_to(x.astype(w1.dtype), (b_pad, v_pad))
    grid = (b_pad // tb, v_pad // tk)
    out = pl.pallas_call(
        _fused_softmax_kernel,
        out_shape=jax.ShapeDtypeStruct((b_pad, nx_pad), out_dtype),
        grid_spec=pltpu.PrefetchScalarGridSpec(
            num_scalar_prefetch=0,
            grid=grid,
            in_specs=[
                pl.BlockSpec((tb, tk), lambda i, k: (i, k)),
                pl.BlockSpec((tk, e_pad), lambda i, k: (k, 0)),
                # constant-index blocks: single-buffered (halve their VMEM)
                pl.BlockSpec((1, e_pad), lambda i, k: (0, 0),
                             pipeline_mode=pl.Buffered(1)),
                pl.BlockSpec((e_pad, nx_pad), lambda i, k: (0, 0),
                             pipeline_mode=pl.Buffered(1)),
                pl.BlockSpec((1, nx_pad), lambda i, k: (0, 0),
                             pipeline_mode=pl.Buffered(1)),
            ],
            out_specs=pl.BlockSpec((tb, nx_pad), lambda i, k: (i, 0)),
            scratch_shapes=[pltpu.VMEM((tb, e_pad), jnp.float32)],
        ),
        compiler_params=pltpu.CompilerParams(
            dimension_semantics=("parallel", "arbitrary"),
            vmem_limit_bytes=_vmem_limit(),
        ),
    )(x_p, w1, b1, w2, b2)
    return out[:batch, :out_dim]


# -----------------------------------------------------------------------------
# Kernel 3: class-tiled two-phase (online) softmax over h @ W2 + b2
#   grid = (batch, phase, class_tile); phase 0 accumulates running max/sum,
#   phase 1 recomputes the class tile and writes the normalized output tile.
#   W2 column tiles stream through the pipeline, never fully resident.
# -----------------------------------------------------------------------------
def _tiled_softmax_kernel(h_ref, w2_ref, b2_ref, o_ref, m_ref, l_ref):
    p = pl.program_id(1)
    j = pl.program_id(2)

    @pl.when((p == 0) & (j == 0))
    def _():
        m_ref[...] = jnp.full_like(m_ref, -jnp.inf)
        l_ref[...] = jnp.zeros_like(l_ref)

    logits = jnp.dot(h_ref[...], w2_ref[...],
                     preferred_element_type=jnp.float32) + b2_ref[...]

    @pl.when(p == 0)
    def _():
        m_new = jnp.maximum(m_ref[...], jnp.max(logits, axis=-1, keepdims=True))
        l_ref[...] = (l_ref[...] * jnp.exp(m_ref[...] - m_new)
                      + jnp.sum(jnp.exp(logits - m_new), axis=-1, keepdims=True))
        m_ref[...] = m_new

    @pl.when(p == 1)
    def _():
        inv_l = 1.0 / l_ref[...]
        o_ref[...] = (jnp.exp(logits - m_ref[...]) * inv_l).astype(o_ref.dtype)


def class_tiled_softmax(h_pad, w2, b2, batch, out_dim, out_dtype, tn):
    b_pad, e_pad = h_pad.shape
    _, nx_pad = w2.shape
    tb = min(b_pad, 256)
    assert nx_pad % tn == 0 and b_pad % tb == 0
    grid = (b_pad // tb, 2, nx_pad // tn)        # (batch, phase, class tiles)
    out = pl.pallas_call(
        _tiled_softmax_kernel,
        out_shape=jax.ShapeDtypeStruct((b_pad, nx_pad), out_dtype),
        grid_spec=pltpu.PrefetchScalarGridSpec(
            num_scalar_prefetch=0,
            grid=grid,
            in_specs=[
                pl.BlockSpec((tb, e_pad), lambda i, p, j: (i, 0)),
                pl.BlockSpec((e_pad, tn), lambda i, p, j: (0, j)),
                pl.BlockSpec((1, tn), lambda i, p, j: (0, j)),
            ],
            out_specs=pl.BlockSpec((tb, tn), lambda i, p, j: (i, j)),
            scratch_shapes=[pltpu.VMEM((tb, 1), jnp.float32),   # running max
                            pltpu.VMEM((tb, 1), jnp.float32)],  # running sum
        ),
        compiler_params=pltpu.CompilerParams(
            dimension_semantics=("parallel", "arbitrary", "arbitrary"),
            vmem_limit_bytes=_vmem_limit(),
        ),
    )(h_pad, w2, b2)
    return out[:batch, :out_dim]


# -----------------------------------------------------------------------------
# Kernel 4: embedding lookup as a one-hot MXU gather over a 2-D table
# -----------------------------------------------------------------------------
def _emb_gather_kernel(idx_ref, table_ref, o_ref, acc_ref):
    k = pl.program_id(1)

    @pl.when(k == 0)
    def _():
        acc_ref[...] = jnp.zeros_like(acc_ref)

    tb = o_ref.shape[0]
    tr = table_ref.shape[0]
    row0 = k * tr
    ids = idx_ref[...]                                           # (tb, 1) int32
    cols = row0 + jax.lax.broadcasted_iota(jnp.int32, (tb, tr), 1)
    onehot = (ids == cols).astype(table_ref.dtype)               # (tb, tr)
    acc_ref[...] += jnp.dot(onehot, table_ref[...],
                            preferred_element_type=jnp.float32)

    @pl.when(k == pl.num_programs(1) - 1)
    def _():
        o_ref[...] = acc_ref[...].astype(o_ref.dtype)


def embedding_lookup(idx, table, row_tile, out_dtype):
    """idx: int32 [B]; table: [nx_pad, e_pad] -> [B, e_pad] (one-hot MXU gather)."""
    batch = idx.shape[0]
    nx_pad, e_pad = table.shape
    assert nx_pad % row_tile == 0
    b_pad, tb = _pad_batch(batch, table.dtype)
    idx_p = _pad_to(idx.astype(jnp.int32), (b_pad,)).reshape(b_pad, 1)
    n_row_tiles = nx_pad // row_tile
    if n_row_tiles == 1:
        # table fully resident & index constant -> single-buffer it
        table_spec = pl.BlockSpec((row_tile, e_pad), lambda i, k: (k, 0),
                                  pipeline_mode=pl.Buffered(1))
    else:
        table_spec = pl.BlockSpec((row_tile, e_pad), lambda i, k: (k, 0))
    out = pl.pallas_call(
        _emb_gather_kernel,
        out_shape=jax.ShapeDtypeStruct((b_pad, e_pad), out_dtype),
        grid_spec=pltpu.PrefetchScalarGridSpec(
            num_scalar_prefetch=0,
            grid=(b_pad // tb, n_row_tiles),          # row-tile reduction last
            in_specs=[pl.BlockSpec((tb, 1), lambda i, k: (i, 0)), table_spec],
            out_specs=pl.BlockSpec((tb, e_pad), lambda i, k: (i, 0)),
            scratch_shapes=[pltpu.VMEM((tb, e_pad), jnp.float32)],
        ),
        compiler_params=pltpu.CompilerParams(
            dimension_semantics=("parallel", "arbitrary"),
            vmem_limit_bytes=_vmem_limit(),
        ),
    )(idx_p, table)
    return out[:batch]


# -----------------------------------------------------------------------------
# Module wrapper (parameter setup is plain JAX glue)
# -----------------------------------------------------------------------------
class NeuralNetUnsupervisedPallas:
    def __init__(self, num_ver, num_x, embedding_size, neg_samp, key,
                 compute_dtype=jnp.bfloat16,
                 force_class_tiled_softmax=False, softmax_class_tile=512):
        self.num_ver = int(num_ver)
        self.num_x = int(num_x)
        self.embedding_size = int(embedding_size)
        self.neg_samp = neg_samp
        self.compute_dtype = compute_dtype

        v_pad, _ = _pad_dim(self.num_ver, 512)
        e_pad, _ = _pad_dim(self.embedding_size, 512)
        self.e_pad = e_pad

        k1, k2, k3, k4, k5 = jax.random.split(key, 5)

        # fc_gx: Linear(num_ver -> E), PyTorch default init; stored pre-transposed [in, out].
        bound1 = 1.0 / float(self.num_ver) ** 0.5
        w1 = jax.random.uniform(k1, (self.num_ver, self.embedding_size),
                                jnp.float32, -bound1, bound1)
        b1 = jax.random.uniform(k2, (1, self.embedding_size),
                                jnp.float32, -bound1, bound1)
        self.w1 = _pad_to(w1, (v_pad, e_pad)).astype(compute_dtype)   # zero padding
        self.b1 = _pad_to(b1, (1, e_pad))                             # bias stays f32

        if self.neg_samp > 0:
            # embedding_l_gy: Embedding(num_x, E), N(0,1) init; compute-dtype table.
            isz = jnp.dtype(compute_dtype).itemsize
            emb_nx_pad, self.emb_row_tile = _emb_row_tiling(self.num_x, e_pad, isz)
            emb = jax.random.normal(k3, (self.num_x, self.embedding_size), jnp.float32)
            self.emb_table = _pad_to(emb, (emb_nx_pad, e_pad)).astype(compute_dtype)
        else:
            # fc_gx2: Linear(E -> num_x) + Softmax over the last dim.
            bound2 = 1.0 / float(self.embedding_size) ** 0.5
            w2 = jax.random.uniform(k4, (self.embedding_size, self.num_x),
                                    jnp.float32, -bound2, bound2)
            b2 = jax.random.uniform(k5, (1, self.num_x), jnp.float32, -bound2, bound2)
            nx128 = _round_up(self.num_x, 128)
            self.use_fused = ((not force_class_tiled_softmax)
                              and _fused_softmax_fits(v_pad, e_pad, nx128, compute_dtype))
            if self.use_fused:
                nx_pad = nx128
                self.softmax_tn = None
            else:
                tn = int(softmax_class_tile)
                assert tn % 128 == 0
                nx_pad = _round_up(self.num_x, tn)
                self.softmax_tn = tn
            self.w2 = _pad_to(w2, (e_pad, nx_pad)).astype(compute_dtype)
            # Padded logit columns get a huge negative bias -> softmax over the real
            # classes is unchanged (padded probabilities underflow to exactly 0).
            self.b2 = jnp.full((1, nx_pad), -1e30, jnp.float32).at[:, :self.num_x].set(b2)

    def __call__(self, gx, gy):
        if self.neg_samp > 0:
            h_pad = linear_relu_padded(gx, self.w1, self.b1, self.compute_dtype)
            l_gx = h_pad[:gx.shape[0], :self.embedding_size]
            idx = jnp.clip(gy.astype(jnp.int32), 0, self.num_x - 1)   # guard OOB indices
            l_gy = embedding_lookup(idx, self.emb_table, self.emb_row_tile,
                                    self.compute_dtype)[:, :self.embedding_size]
            return l_gy, l_gx
        if self.use_fused:
            return fused_linear_relu_linear_softmax(
                gx, self.w1, self.b1, self.w2, self.b2, self.num_x, self.compute_dtype)
        h_pad = linear_relu_padded(gx, self.w1, self.b1, self.compute_dtype)
        return class_tiled_softmax(h_pad, self.w2, self.b2, gx.shape[0], self.num_x,
                                   self.compute_dtype, self.softmax_tn)

    def get_hiddenLayer(self):
        # nn.Linear stores weight as [out, in]; return the unpadded f32 equivalent.
        return self.w1[:self.num_ver, :self.embedding_size].astype(jnp.float32).T


# -----------------------------------------------------------------------------
# demo / correctness checks
# -----------------------------------------------------------------------------
if __name__ == "__main__":
    key = jax.random.PRNGKey(0)
    k_in, k_idx, k_m1, k_m2, k_m3, k_m4 = jax.random.split(key, 6)

    B = 4           # batch
    NUM_VER = 16    # input feature dim
    NUM_X = 8       # vocabulary / output classes
    EMB = 32        # embedding size

    gx = jax.random.normal(k_in, (B, NUM_VER), jnp.float32)
    gy = jax.random.randint(k_idx, (B,), 0, NUM_X, jnp.int32)

    # ---- neg_samp > 0 branch (f32 compute for tight checks) ----------------
    m1 = NeuralNetUnsupervisedPallas(NUM_VER, NUM_X, EMB, neg_samp=5, key=k_m1,
                                     compute_dtype=jnp.float32)
    l_gy, l_gx = m1(gx, gy)
    l_gy = jax.block_until_ready(l_gy)
    l_gx = jax.block_until_ready(l_gx)
    w1 = m1.w1[:NUM_VER, :EMB].astype(jnp.float32)
    b1 = m1.b1[:, :EMB]
    ref_gx = jnp.maximum(gx @ w1 + b1, 0.0)
    ref_gy = m1.emb_table[gy][:, :EMB].astype(jnp.float32)
    assert l_gx.shape == (B, EMB) and l_gy.shape == (B, EMB)
    assert jnp.allclose(l_gx, ref_gx, atol=1e-5), "linear+relu mismatch"
    assert jnp.allclose(l_gy, ref_gy, atol=1e-6), "embedding gather mismatch"

    # ---- neg_samp <= 0 branch: fused linear+relu+linear+softmax (f32) ------
    m2 = NeuralNetUnsupervisedPallas(NUM_VER, NUM_X, EMB, neg_samp=0, key=k_m2,
                                     compute_dtype=jnp.float32)
    assert m2.use_fused
    probs = jax.block_until_ready(m2(gx, gy))
    w1 = m2.w1[:NUM_VER, :EMB].astype(jnp.float32)
    b1 = m2.b1[:, :EMB]
    w2 = m2.w2[:EMB, :NUM_X].astype(jnp.float32)
    b2 = m2.b2[:, :NUM_X]
    ref_p = jax.nn.softmax(jnp.maximum(gx @ w1 + b1, 0.0) @ w2 + b2, axis=-1)
    assert probs.shape == (B, NUM_X)
    assert jnp.allclose(probs, ref_p, atol=1e-4), "fused linear+softmax mismatch"

    # ---- neg_samp <= 0 branch: forced class-tiled online softmax (f32) -----
    NUM_X2, EMB2 = 200, 64        # nx_pad=256, tile=128 -> exercises 2 class tiles
    m3 = NeuralNetUnsupervisedPallas(NUM_VER, NUM_X2, EMB2, neg_samp=0, key=k_m3,
                                     compute_dtype=jnp.float32,
                                     force_class_tiled_softmax=True,
                                     softmax_class_tile=128)
    assert not m3.use_fused
    probs2 = jax.block_until_ready(m3(gx, gy))
    w1 = m3.w1[:NUM_VER, :EMB2].astype(jnp.float32)
    b1 = m3.b1[:, :EMB2]
    w2 = m3.w2[:EMB2, :NUM_X2].astype(jnp.float32)
    b2 = m3.b2[:, :NUM_X2]
    ref_p2 = jax.nn.softmax(jnp.maximum(gx @ w1 + b1, 0.0) @ w2 + b2, axis=-1)
    assert probs2.shape == (B, NUM_X2)
    assert jnp.allclose(probs2, ref_p2, atol=1e-4), "class-tiled softmax mismatch"

    # ---- bf16 compute smoke tests (production dtype per perf review) -------
    m4 = NeuralNetUnsupervisedPallas(NUM_VER, NUM_X, EMB, neg_samp=0, key=k_m4,
                                     compute_dtype=jnp.bfloat16)
    p4 = jax.block_until_ready(m4(gx, gy)).astype(jnp.float32)
    assert p4.shape == (B, NUM_X)
    assert bool(jnp.all(jnp.isfinite(p4)))
    assert jnp.allclose(jnp.sum(p4, axis=-1), 1.0, atol=2e-2), "bf16 softmax rows"

    m5 = NeuralNetUnsupervisedPallas(NUM_VER, NUM_X, EMB, neg_samp=5, key=k_m1,
                                     compute_dtype=jnp.bfloat16)
    l_gy5, l_gx5 = m5(gx, gy)
    jax.block_until_ready((l_gy5, l_gx5))
    assert l_gy5.shape == (B, EMB) and l_gx5.shape == (B, EMB)

    print("KERNEL_OK")
</pallas_src>

<mosaic_0001>
module attributes {stable_mosaic.version = 11 : i64} {
  func.func @_linear_relu_kernel(%arg0: i32, %arg1: i32, %arg2: i32, %arg3: memref<8x128xf32, #tpu.memory_space<vmem>>, %arg4: memref<128x128xf32, #tpu.memory_space<vmem>>, %arg5: memref<1x128xf32, #tpu.memory_space<vmem>>, %arg6: memref<8x128xf32, #tpu.memory_space<vmem>>, %arg7: memref<8x128xf32, #tpu.memory_space<vmem>>) attributes {dimension_semantics = [#tpu.dimension_semantics<parallel>, #tpu.dimension_semantics<parallel>, #tpu.dimension_semantics<arbitrary>], iteration_bounds = array<i64: 1, 1, 1>, scalar_prefetch = 0 : i64, scratch_operands = 1 : i64, tpu.core_type = #tpu.core_type<tc>, window_params = [{transform_indices = @transform_0, window_bounds = array<i64: 8, 128>}, {transform_indices = @transform_1, window_bounds = array<i64: 128, 128>}, {transform_indices = @transform_2, window_bounds = array<i64: 1, 128>}, {transform_indices = @transform_3, window_bounds = array<i64: 8, 128>}]} {
    %c0_i32 = arith.constant 0 : i32
    %0 = arith.cmpi eq, %arg2, %c0_i32 : i32
    %1 = arith.extui %0 : i1 to i32
    %c0_i32_0 = arith.constant 0 : i32
    %2 = arith.cmpi ne, %1, %c0_i32_0 : i32
    scf.if %2 {
      %cst_10 = arith.constant 0.000000e+00 : f32
      %12 = vector.broadcast %cst_10 : f32 to vector<8x128xf32>
      %c0_11 = arith.constant 0 : index
      %c0_12 = arith.constant 0 : index
      %13 = vector.load %arg7[%c0_11, %c0_12] : memref<8x128xf32, #tpu.memory_space<vmem>>, vector<8x128xf32>
      tpu.vector_store %arg7[%c0_11, %c0_12], %12 {strides = array<i32>} : memref<8x128xf32, #tpu.memory_space<vmem>>, vector<8x128xf32>,
    } else {
    }
    %c0 = arith.constant 0 : index
    %c0_1 = arith.constant 0 : index
    %3 = vector.load %arg7[%c0, %c0_1] : memref<8x128xf32, #tpu.memory_space<vmem>>, vector<8x128xf32>
    %c0_2 = arith.constant 0 : index
    %c0_3 = arith.constant 0 : index
    %4 = vector.load %arg3[%c0_2, %c0_3] : memref<8x128xf32, #tpu.memory_space<vmem>>, vector<8x128xf32>
    %c0_4 = arith.constant 0 : index
    %c0_5 = arith.constant 0 : index
    %5 = vector.load %arg4[%c0_4, %c0_5] : memref<128x128xf32, #tpu.memory_space<vmem>>, vector<128x128xf32>
    %cst = arith.constant dense<0.000000e+00> : vector<8x128xf32>
    %6 = tpu.matmul %4, %5, %cst {dimension_numbers = #tpu.dot_dimension_numbers<[1], [0], [0], [1], [0, 0, 1, 1], [], []>} : vector<8x128xf32>, vector<128x128xf32>, vector<8x128xf32> -> vector<8x128xf32>
    %7 = arith.addf %3, %6 : vector<8x128xf32>
    %c0_6 = arith.constant 0 : index
    %c0_7 = arith.constant 0 : index
    %8 = vector.load %arg7[%c0_6, %c0_7] : memref<8x128xf32, #tpu.memory_space<vmem>>, vector<8x128xf32>
    tpu.vector_store %arg7[%c0_6, %c0_7], %7 {strides = array<i32>} : memref<8x128xf32, #tpu.memory_space<vmem>>, vector<8x128xf32>,
    %c0_i32_8 = arith.constant 0 : i32
    %9 = arith.cmpi eq, %arg2, %c0_i32_8 : i32
    %10 = arith.extui %9 : i1 to i32
    %c0_i32_9 = arith.constant 0 : i32
    %11 = arith.cmpi ne, %10, %c0_i32_9 : i32
    scf.if %11 {
      %c0_10 = arith.constant 0 : index
      %c0_11 = arith.constant 0 : index
      %12 = vector.load %arg7[%c0_10, %c0_11] : memref<8x128xf32, #tpu.memory_space<vmem>>, vector<8x128xf32>
      %c0_12 = arith.constant 0 : index
      %c0_13 = arith.constant 0 : index
      %13 = vector.load %arg5[%c0_12, %c0_13] : memref<1x128xf32, #tpu.memory_space<vmem>>, vector<1x128xf32>
      %14 = vector.broadcast %13 : vector<1x128xf32> to vector<8x128xf32>
      %15 = arith.addf %12, %14 : vector<8x128xf32>
      %cst_14 = arith.constant 0.000000e+00 : f32
      %16 = vector.broadcast %cst_14 : f32 to vector<8x128xf32>
      %17 = arith.maximumf %15, %16 : vector<8x128xf32>
      %c0_15 = arith.constant 0 : index
      %c0_16 = arith.constant 0 : index
      %18 = vector.load %arg6[%c0_15, %c0_16] : memref<8x128xf32, #tpu.memory_space<vmem>>, vector<8x128xf32>
      tpu.vector_store %arg6[%c0_15, %c0_16], %17 {strides = array<i32>} : memref<8x128xf32, #tpu.memory_space<vmem>>, vector<8x128xf32>,
    } else {
    }
    return
  }
  func.func @transform_0(%arg0: i32, %arg1: i32, %arg2: i32) -> (i32, i32) {
    %c0_i32 = arith.constant 0 : i32
    return %arg0, %arg2 : i32, i32
  }
  func.func @transform_1(%arg0: i32, %arg1: i32, %arg2: i32) -> (i32, i32) {
    %c0_i32 = arith.constant 0 : i32
    return %arg2, %arg1 : i32, i32
  }
  func.func @transform_2(%arg0: i32, %arg1: i32, %arg2: i32) -> (i32, i32) {
    %c0_i32 = arith.constant 0 : i32
    %c0_i32_0 = arith.constant 0 : i32
    return %c0_i32, %arg1 : i32, i32
  }
  func.func @transform_3(%arg0: i32, %arg1: i32, %arg2: i32) -> (i32, i32) {
    %c0_i32 = arith.constant 0 : i32
    return %arg0, %arg1 : i32, i32
  }
}

</mosaic_0001>

<bundles_post_ra>
// kernel: tpu_custom_call.1
= control target key start
LH: loop header
LB: loop body
LE: loop exit
PB: predicated region body
PF: predicated region fallthrough
CT: control target
= control target key end

     0   :  { %8 = vsyncpa [#allocation4], 0  ;;  %s397_s0 = inlined_call_operand.hbm [shape: f32[8,128], index: 0, kind: input, shape index: {}]   ;;  %s398_s1 = inlined_call_operand.hbm [shape: f32[128,128], index: 1, kind: input, shape index: {}]   ;;  %s399_s2 = inlined_call_operand.vmem [shape: f32[1,128], index: 2, kind: input, shape index: {}]   ;;  %s400_s3 = inlined_call_operand.hbm [shape: f32[8,128], index: 3, kind: output, shape index: {}]  }
   0x1   :  { %9 = vsyncpa [#allocation7], 0 }
   0x2   :  { %10 = vsyncpa [#allocation5], 0  ;;  %s323_s12 = smov [#allocation3]   ;;  %s324_s14 = smov [#allocation6]  }
   0x3   :  { %s17_s13 = sshll.u32 %s323_s12, 4  ;;  %s26_s15 = sshll.u32 %s324_s14, 4  ;;  %s18_s13 = int_to_ptr.vmem [resolvable:$true] %s17_s13  ;;  %s351_s15 = int_to_ptr.vmem [resolvable:$true] %s26_s15 }
   0x4   :  { %s251_s18 = scalar_lea.hbm %s397_s0, 128 }
   0x5   :  { %p252_p0 = scmp.ne.s32.totalorder %s397_s0, %s251_s18  ;;  %p255_p1 = scmp.lt.u32.totalorder %s251_s18, %s397_s0 }
   0x7   :  { %p257_p2 = pnand %p255_p1, %p252_p0 }
   0x9   :  { %260 = shalt.err (!%p257_p2)
}
   0xa   :  { %s261_s23 = scalar_lea.vmem %s18_s13, 128  ;;  %p266_p4 = scmp.lt.s32.totalorder %s18_s13, %s18_s13 }
   0xb   :  { %p262_p3 = scmp.ne.s32.totalorder %s18_s13, %s261_s23  ;;  %p267_p5 = scmp.lt.s32.totalorder %s261_s23, %s261_s23 }
   0xd   :  { %p268_p6 = por %p267_p5, %p266_p4 }
   0xf   :  { %p269_p7 = pnand %p268_p6, %p262_p3 }
  0x11   :  { %272 = shalt.err (!%p269_p7)
}
  0x12   :  { %20 = dma.hbm_to_vmem [thread:$0]  %s397_s0, 128, %s18_s13, [#allocation4]  }
  0x13   :  { %s273_s28 = scalar_lea.hbm %s398_s1, 2048 }
  0x14   :  { %p274_p8 = scmp.ne.s32.totalorder %s398_s1, %s273_s28  ;;  %p277_p9 = scmp.lt.u32.totalorder %s273_s28, %s398_s1 }
  0x16   :  { %p279_p10 = pnand %p277_p9, %p274_p8 }
  0x18   :  { %282 = shalt.err (!%p279_p10)
}
  0x19   :  { %s283_s6 = scalar_lea.vmem %s351_s15, 2048  ;;  %p288_p12 = scmp.lt.s32.totalorder %s351_s15, %s351_s15 }
  0x1a   :  { %p284_p11 = scmp.ne.s32.totalorder %s351_s15, %s283_s6  ;;  %p289_p13 = scmp.lt.s32.totalorder %s283_s6, %s283_s6 }
  0x1c   :  { %p290_p0 = por %p289_p13, %p288_p12 }
  0x1e   :  { %p291_p1 = pnand %p290_p0, %p284_p11 }
  0x20   :  { %294 = shalt.err (!%p291_p1)
}
  0x21   :  { %s325_s0 = smov 128   ;;  %s326_s7 = smov 8  }
  0x22   :  { %32 = dma.hbm_to_vmem [thread:$0]  %s398_s1, 2048, %s351_s15, [#allocation7], %s325_s0, %s325_s0, %s326_s7  }
  0x23   :  { %317 = dma.done.wait [#allocation4], 128  }
  0x24   :  { %318 = vsyncadd [#allocation4], 4294967168 }
  0x25   :  { %319 = dma.done.wait [#allocation7], 2048  }
  0x26   :  { %320 = vsyncadd [#allocation7], 4294965248  ;;  %v327_v0 = vmov 0.0|0.0   ;;  %vm328_vm0 = vmmov 0   ;;  %v329_v1 = vmov 0.0   ;;  %v48_v2 = vld [vmem:[#allocation6] sm:$0xff] }
  0x27   :  { %219 = vmatprep.subr.bf16.mxu0 %v327_v0  ;;  %216 = vmatprep.mubr.msk.f32.mxu0 %vm328_vm0, %v329_v1  ;;  %v49_v3 = vld [vmem:[#allocation6 + $0x8] sm:$0xff]  ;;  %v50_v4 = vld [vmem:[#allocation6 + $0x10] sm:$0xff]  ;;  %v51_v6 = vld [vmem:[#allocation6 + $0x18] sm:$0xff]  ;;  %s330_s11 = smov [#allocation8]  }
  0x28   :  { %v220_v5 = vpack.c.bf16 %v49_v3, %v48_v2  ;;  %v223_v7 = vpack.c.bf16 %v51_v6, %v50_v4  ;;  %v52_v8 = vld [vmem:[#allocation6 + $0x20] sm:$0xff]  ;;  %v53_v9 = vld [vmem:[#allocation6 + $0x28] sm:$0xff]  ;;  %v54_v11 = vld [vmem:[#allocation6 + $0x30] sm:$0xff]  ;;  %s156_s12 = sshll.u32 %s330_s11, 4  ;;  %s157_s12 = int_to_ptr.vmem [resolvable:$true] %s156_s12 }
  0x29   :  { %v226_v10 = vpack.c.bf16 %v53_v9, %v52_v8  ;;  %v55_v12 = vld [vmem:[#allocation6 + $0x38] sm:$0xff]  ;;  %v56_v14 = vld [vmem:[#allocation6 + $0x40] sm:$0xff]  ;;  %v57_v15 = vld [vmem:[#allocation6 + $0x48] sm:$0xff]  ;;  %s295_s13 = scalar_lea.vmem %s157_s12, 128  ;;  %p300_p3 = scmp.lt.s32.totalorder %s157_s12, %s157_s12 }
  0x2a   :  { %221 = vmatpush3.bf16.msra.mxu0 %v220_v5  ;;  %v229_v13 = vpack.c.bf16 %v55_v12, %v54_v11  ;;  %v232_v16 = vpack.c.bf16 %v57_v15, %v56_v14  ;;  %v58_v17 = vld [vmem:[#allocation6 + $0x50] sm:$0xff]  ;;  %v59_v18 = vld [vmem:[#allocation6 + $0x58] sm:$0xff]  ;;  %v60_v20 = vld [vmem:[#allocation6 + $0x60] sm:$0xff]  ;;  %p296_p2 = scmp.ne.s32.totalorder %s157_s12, %s295_s13  ;;  %p301_p4 = scmp.lt.s32.totalorder %s295_s13, %s295_s13 }
  0x2b   :  { %222 = vmatprep.subr.bf16.mxu0 %v327_v0  ;;  %v235_v19 = vpack.c.bf16 %v59_v18, %v58_v17  ;;  %v61_v21 = vld [vmem:[#allocation6 + $0x68] sm:$0xff]  ;;  %v62_v23 = vld [vmem:[#allocation6 + $0x70] sm:$0xff]  ;;  %v63_v24 = vld [vmem:[#allocation6 + $0x78] sm:$0xff] }
  0x2c   :  { %v238_v22 = vpack.c.bf16 %v61_v21, %v60_v20  ;;  %v241_v25 = vpack.c.bf16 %v63_v24, %v62_v23  ;;  %v47_v26 = vld [vmem:[#allocation3] sm:$0xff]  ;;  %p302_p5 = por %p301_p4, %p300_p3 }
  0x2d   :  { %v166_v27 = vld [vmem:[%s399_s2] ss:$0 sm:$0xff] }
  0x2e   :  { %224 = vmatpush3.bf16.msra.mxu0 %v223_v7  ;;  %p303_p6 = pnand %p302_p5, %p296_p2 }
  0x2f   :  { %225 = vmatprep.subr.bf16.mxu0 %v327_v0 }
  0x32   :  { %227 = vmatpush3.bf16.msra.mxu0 %v226_v10 }
  0x33   :  { %228 = vmatprep.subr.bf16.mxu0 %v327_v0 }
  0x36   :  { %230 = vmatpush3.bf16.msra.mxu0 %v229_v13 }
  0x37   :  { %231 = vmatprep.subr.bf16.mxu0 %v327_v0 }
  0x3a   :  { %233 = vmatpush3.bf16.msra.mxu0 %v232_v16 }
  0x3b   :  { %234 = vmatprep.subr.bf16.mxu0 %v327_v0 }
  0x3e   :  { %236 = vmatpush3.bf16.msra.mxu0 %v235_v19 }
  0x3f   :  { %237 = vmatprep.subr.bf16.mxu0 %v327_v0 }
  0x42   :  { %239 = vmatpush3.bf16.msra.mxu0 %v238_v22 }
  0x43   :  { %240 = vmatprep.subr.bf16.mxu0 %v327_v0 }
  0x46   :  { %242 = vmatpush3.bf16.msra.mxu0 %v241_v25 }
  0x49   :  { %217 = vmatmul.mubr.f32.vlgmr.msra.gmra.mrb[0].mxu0 %v47_v26 }
 0x11c   :  { %v130_v28 = vpop.f32.mrb[0].mxu0 }
 0x11d   :  { %v147_v29 = vadd.f32 %v166_v27, %v130_v28  ;;  %v218_v30 = vpop.f32.mrb[1].mxu0 }
 0x11f   :  { %v148_v31 = vmax.f32 %v147_v29, 0.0 }
 0x121   :  { %149 = vst [vmem:[#allocation8] sm:$0xff] %v148_v31 }
 0x122   :  { %306 = shalt.err (!%p303_p6)
}
 0x123   :  { %s307_s16 = scalar_lea.hbm %s400_s3, 128 }
 0x124   :  { %p308_p7 = scmp.ne.s32.totalorder %s400_s3, %s307_s16  ;;  %p311_p8 = scmp.lt.u32.totalorder %s307_s16, %s400_s3 }
 0x126   :  { %p313_p9 = pnand %p311_p8, %p308_p7 }
 0x128   :  { %316 = shalt.err (!%p313_p9)
}
 0x129   :  { %159 = dma.vmem_to_hbm [thread:$0]  %s157_s12, 128, %s400_s3, [#allocation5]  }
 0x12a   :  { %321 = dma.done.wait [#allocation5], 128  }
 0x12b   :  { %322 = vsyncadd [#allocation5], 4294967168 }
 0x12c   :  { %163 = vsyncpa [#allocation4], 1 }
 0x12d   :  { %164 = vsyncpa [#allocation7], 1 }
 0x12e   :  { %165 = vsyncpa [#allocation5], 1 }

</bundles_post_ra>
